<compile_context>
chip_gen: v7x
topology: tpu7x:2x2x1
jax: 0.10.0
libtpu: 0.0.40
codegen_flags: <defaults>
</compile_context>

<pallas_src>
import jax
import jax.numpy as jnp
import numpy as np
from jax import lax
from jax.experimental import pallas as pl
from jax.experimental.pallas import tpu as pltpu

GOAL_DIM = 2
LARGE_GOALS_NP = np.array(
    [[12, 0], [12, 7], [0, 7], [4, 15], [0, 22], [20, 7], [20, 15], [20, 22],
     [12, 22], [12, 15], [20, 0], [28, 0], [28, 7], [36, 0], [36, 7], [36, 15],
     [28, 15], [28, 22], [36, 24]], dtype=np.float32)
NUM_GOALS = LARGE_GOALS_NP.shape[0]        # 19
NG_PAD = 24                                # goals padded to a multiple of 8 sublanes
PAD_COORD = 1.0e6                          # sentinel coordinate for pad goal rows
CHUNK = 512                                # lanes per inner-loop chunk (vreg pressure bound)
MAX_TBL = 4096                             # max lanes per grid step
BIG = 1.0e30                               # f32 sentinel for masked min (>> any dist_sq)


def _goal_select_kernel(lg_ref, goals_ref, out_ref):
    # lg_ref   : (4, TBL)      f32 -- rows: loc_x, loc_y, gg_x, gg_y; batch on lanes
    # goals_ref: (NG_PAD, 2)   f32 -- col 0 = goal x, col 1 = goal y; pad rows = PAD_COORD
    # out_ref  : (2, TBL)      f32 -- rows: selected goal x / y; batch on lanes
    tbl = lg_ref.shape[1]
    chunk = tbl if tbl <= CHUNK else CHUNK          # wrapper guarantees chunk | tbl
    nchunks = tbl // chunk

    goals = goals_ref[...]                          # (NG_PAD, 2), tiny, loop-invariant
    gx_col = goals[:, 0:1]                          # (NG_PAD, 1)
    gy_col = goals[:, 1:2]

    def body(c, carry):
        start = pl.multiple_of(c * chunk, 128)
        lg = lg_ref[:, pl.ds(start, chunk)]         # (4, chunk)
        loc_x = lg[0:1, :]
        loc_y = lg[1:2, :]
        gg_x = lg[2:3, :]
        gg_y = lg[3:4, :]

        gidx = lax.broadcasted_iota(jnp.int32, (NG_PAD, chunk), 0)

        # Squared distances only (no sqrt): comparisons are monotone-equivalent, and the
        # pad goal rows (PAD_COORD) get dist_sq ~ 2e12 which excludes them everywhere.
        gx = jnp.broadcast_to(gx_col, (NG_PAD, chunk))
        gy = jnp.broadcast_to(gy_col, (NG_PAD, chunk))
        dist_sq = (loc_x - gx) ** 2 + (loc_y - gy) ** 2        # ||loc - g||^2
        ggd_sq = (gx - gg_x) ** 2 + (gy - gg_y) ** 2           # ||g - gg||^2
        # gx/gy die here; re-broadcast later for the gather to keep live ranges short.
        ref_sq = (loc_x - gg_x) ** 2 + (loc_y - gg_y) ** 2     # ||loc - gg||^2, (1, chunk)

        cond = ggd_sq < ref_sq                                 # (NG_PAD, chunk)

        # XLU pass 1: closest-to-loc (squared) distance among cond-satisfying goals.
        d_min = jnp.min(jnp.where(cond, dist_sq, BIG), axis=0, keepdims=True)
        any_cond = d_min < BIG                                 # fused "any(cond)"

        # XLU pass 2: smallest goal index achieving d_min under cond (stable tie-break).
        g_star = jnp.min(jnp.where(cond & (dist_sq == d_min), gidx, NG_PAD),
                         axis=0, keepdims=True)                # (1, chunk) int32

        # XLU pass 3: stable-argsort rank of g_star among all real goals.
        rank_pred = (dist_sq < d_min) | ((dist_sq == d_min) & (gidx < g_star))
        rank = jnp.sum(rank_pred.astype(jnp.int32), axis=0, keepdims=True)

        selected = jnp.where(any_cond, rank, 0)                # argmax(cond_sorted)

        # XLU passes 4-5: goals[selected] via one-hot gather along the goal axis.
        # selected < NUM_GOALS always, so pad rows (sentinel coords) never leak.
        onehot = gidx == selected
        gx2 = jnp.broadcast_to(gx_col, (NG_PAD, chunk))
        gy2 = jnp.broadcast_to(gy_col, (NG_PAD, chunk))
        out_x = jnp.sum(jnp.where(onehot, gx2, 0.0), axis=0, keepdims=True)
        out_y = jnp.sum(jnp.where(onehot, gy2, 0.0), axis=0, keepdims=True)

        out_ref[0:1, pl.ds(start, chunk)] = out_x
        out_ref[1:2, pl.ds(start, chunk)] = out_y
        return carry

    lax.fori_loop(0, nchunks, body, 0, unroll=True)


def _round_up(x, m):
    return ((x + m - 1) // m) * m


def manual_goal_forward(obs_goal):
    """Pallas implementation of ManualGoalNetwork.forward (level='large', goal_dim=2)."""
    obs_goal = jnp.asarray(obs_goal, jnp.float32)
    lead = obs_goal.shape[:-1]
    f = obs_goal.shape[-1]
    x = obs_goal.reshape(-1, f)
    b = x.shape[0]

    # Tiling: single grid step when the batch fits one tile (v5e/v6e have one TC, so the
    # grid is a serial loop -> fewer steps = less per-step overhead).  For batches larger
    # than MAX_TBL keep >=2 steps so the "parallel" axis shards across v7x's 2 TCs.
    bp = _round_up(max(b, 1), 128)
    if bp > CHUNK:
        bp = _round_up(bp, CHUNK)
    if bp <= MAX_TBL:
        tbl, steps = bp, 1
    else:
        steps = max(2, -(-bp // MAX_TBL))
        tbl = _round_up(-(-bp // steps), CHUNK)
        bp = steps * tbl

    # Dense (4, bp) slab: rows = loc_x, loc_y, gg_x, gg_y; batch on the lane axis.
    # Padded columns are all-zero -> ref_sq == 0 -> cond never true -> goals[0], sliced off.
    slab = jnp.concatenate([x[:, :GOAL_DIM], x[:, -GOAL_DIM:]], axis=-1).T   # (4, b)
    if bp != b:
        slab = jnp.pad(slab, ((0, 0), (0, bp - b)))

    goals_pad = np.full((NG_PAD, GOAL_DIM), PAD_COORD, dtype=np.float32)
    goals_pad[:NUM_GOALS] = LARGE_GOALS_NP
    goals = jnp.asarray(goals_pad)

    out = pl.pallas_call(
        _goal_select_kernel,
        out_shape=jax.ShapeDtypeStruct((GOAL_DIM, bp), jnp.float32),
        grid=(steps,),
        in_specs=[
            pl.BlockSpec((4, tbl), lambda i: (0, i)),                 # batch slab
            pl.BlockSpec((NG_PAD, GOAL_DIM), lambda i: (0, 0)),       # goals (constant block)
        ],
        out_specs=pl.BlockSpec((GOAL_DIM, tbl), lambda i: (0, i)),
        compiler_params=pltpu.CompilerParams(dimension_semantics=("parallel",)),
    )(slab, goals)

    # torch returns the (integer-valued) goal coordinates; exact in f32.
    goals_out = out[:, :b].T.astype(jnp.int32)
    return goals_out.reshape(*lead, GOAL_DIM)


def ref_forward(obs_goal):
    """Pure-JAX reference with the exact torch semantics (argsort-based, sqrt norms)."""
    goals = jnp.asarray(LARGE_GOALS_NP)
    loc = obs_goal[..., :GOAL_DIM]
    gg = obs_goal[..., -GOAL_DIM:]
    goal_dist = jnp.linalg.norm(loc[..., None, :] - goals[None, :, :], axis=-1)
    sorted_idx = jnp.argsort(goal_dist, axis=-1)
    prox = (jnp.linalg.norm(goals[sorted_idx] - gg[..., None, :], axis=-1)
            < jnp.linalg.norm(loc - gg, axis=-1)[..., None])
    selected = jnp.argmax(prox.astype(jnp.int32), axis=-1)
    return goals[selected].astype(jnp.int32)


if __name__ == "__main__":
    key = jax.random.PRNGKey(0)
    batch, obs_dim = 2, 8          # obs_goal feature dim = obs_dim + goal_dim = 10
    k1, k2 = jax.random.split(key)
    obs = jax.random.uniform(k1, (batch, obs_dim), minval=0.0, maxval=36.0)
    goal = jax.random.uniform(k2, (batch, GOAL_DIM), minval=0.0, maxval=24.0)
    obs_goal = jnp.concatenate([obs, goal], axis=-1)     # (2, 10)

    out = manual_goal_forward(obs_goal)
    out = jax.block_until_ready(out)

    ref = ref_forward(obs_goal)
    assert out.shape == (batch, GOAL_DIM), out.shape
    assert jnp.array_equal(out, ref), (out, ref)
    print("KERNEL_OK")
</pallas_src>

<mosaic_0001>
module attributes {stable_mosaic.version = 11 : i64} {
  func.func @_goal_select_kernel(%arg0: i32, %arg1: memref<4x128xf32, #tpu.memory_space<vmem>>, %arg2: memref<24x2xf32, #tpu.memory_space<vmem>>, %arg3: memref<2x128xf32, #tpu.memory_space<vmem>>) attributes {dimension_semantics = [#tpu.dimension_semantics<parallel>], iteration_bounds = array<i64: 1>, scalar_prefetch = 0 : i64, scratch_operands = 0 : i64, tpu.core_type = #tpu.core_type<tc>, window_params = [{transform_indices = @transform_0, window_bounds = array<i64: 4, 128>}, {pipeline_mode = #tpu.pipeline_mode<synchronous>, transform_indices = @transform_1, window_bounds = array<i64: 24, 2>}, {transform_indices = @transform_2, window_bounds = array<i64: 2, 128>}]} {
    %c0 = arith.constant 0 : index
    %c0_0 = arith.constant 0 : index
    %0 = vector.load %arg2[%c0, %c0_0] : memref<24x2xf32, #tpu.memory_space<vmem>>, vector<24x2xf32>
    %1 = vector.extract_strided_slice %0 {offsets = [0, 0], sizes = [24, 1], strides = [1, 1]} : vector<24x2xf32> to vector<24x1xf32>
    %2 = vector.extract_strided_slice %0 {offsets = [0, 1], sizes = [24, 1], strides = [1, 1]} : vector<24x2xf32> to vector<24x1xf32>
    %c0_i32 = arith.constant 0 : i32
    %c128_i32 = arith.constant 128 : i32
    %3 = arith.muli %c0_i32, %c128_i32 : i32
    %4 = tpu.assume_multiple %3, 128 : i32
    %c0_1 = arith.constant 0 : index
    %5 = arith.index_cast %4 : i32 to index
    %6 = vector.load %arg1[%c0_1, %5] : memref<4x128xf32, #tpu.memory_space<vmem>>, vector<4x128xf32>
    %7 = vector.extract_strided_slice %6 {offsets = [0, 0], sizes = [1, 128], strides = [1, 1]} : vector<4x128xf32> to vector<1x128xf32>
    %8 = vector.extract_strided_slice %6 {offsets = [1, 0], sizes = [1, 128], strides = [1, 1]} : vector<4x128xf32> to vector<1x128xf32>
    %9 = vector.extract_strided_slice %6 {offsets = [2, 0], sizes = [1, 128], strides = [1, 1]} : vector<4x128xf32> to vector<1x128xf32>
    %10 = vector.extract_strided_slice %6 {offsets = [3, 0], sizes = [1, 128], strides = [1, 1]} : vector<4x128xf32> to vector<1x128xf32>
    %11 = tpu.iota {dimensions = array<i32: 0>} : vector<24x128xi32>
    %12 = vector.shape_cast %1 : vector<24x1xf32> to vector<24x1xf32>
    %13 = vector.broadcast %12 : vector<24x1xf32> to vector<24x128xf32>
    %14 = vector.shape_cast %2 : vector<24x1xf32> to vector<24x1xf32>
    %15 = vector.broadcast %14 : vector<24x1xf32> to vector<24x128xf32>
    %16 = vector.broadcast %7 : vector<1x128xf32> to vector<24x128xf32>
    %17 = arith.subf %16, %13 : vector<24x128xf32>
    %18 = arith.mulf %17, %17 : vector<24x128xf32>
    %19 = vector.broadcast %8 : vector<1x128xf32> to vector<24x128xf32>
    %20 = arith.subf %19, %15 : vector<24x128xf32>
    %21 = arith.mulf %20, %20 : vector<24x128xf32>
    %22 = arith.addf %18, %21 : vector<24x128xf32>
    %23 = vector.broadcast %9 : vector<1x128xf32> to vector<24x128xf32>
    %24 = arith.subf %13, %23 : vector<24x128xf32>
    %25 = arith.mulf %24, %24 : vector<24x128xf32>
    %26 = vector.broadcast %10 : vector<1x128xf32> to vector<24x128xf32>
    %27 = arith.subf %15, %26 : vector<24x128xf32>
    %28 = arith.mulf %27, %27 : vector<24x128xf32>
    %29 = arith.addf %25, %28 : vector<24x128xf32>
    %30 = arith.subf %7, %9 : vector<1x128xf32>
    %31 = arith.mulf %30, %30 : vector<1x128xf32>
    %32 = arith.subf %8, %10 : vector<1x128xf32>
    %33 = arith.mulf %32, %32 : vector<1x128xf32>
    %34 = arith.addf %31, %33 : vector<1x128xf32>
    %35 = vector.broadcast %34 : vector<1x128xf32> to vector<24x128xf32>
    %36 = arith.cmpf olt, %29, %35 : vector<24x128xf32>
    %cst = arith.constant 1.000000e+30 : f32
    %37 = vector.broadcast %cst : f32 to vector<24x128xf32>
    %38 = arith.select %36, %22, %37 : vector<24x128xi1>, vector<24x128xf32>
    %cst_2 = arith.constant dense<0x7F800000> : vector<128xf32>
    %39 = vector.multi_reduction <minimumf>, %38, %cst_2 [0] : vector<24x128xf32> to vector<128xf32>
    %40 = vector.shape_cast %39 : vector<128xf32> to vector<1x128xf32>
    %cst_3 = arith.constant 1.000000e+30 : f32
    %41 = vector.broadcast %cst_3 : f32 to vector<1x128xf32>
    %42 = arith.cmpf olt, %40, %41 : vector<1x128xf32>
    %43 = vector.broadcast %40 : vector<1x128xf32> to vector<24x128xf32>
    %44 = arith.cmpf oeq, %22, %43 : vector<24x128xf32>
    %45 = arith.andi %36, %44 : vector<24x128xi1>
    %c24_i32 = arith.constant 24 : i32
    %46 = vector.broadcast %c24_i32 : i32 to vector<24x128xi32>
    %47 = arith.select %45, %11, %46 : vector<24x128xi1>, vector<24x128xi32>
    %cst_4 = arith.constant dense<2147483647> : vector<128xi32>
    %48 = vector.multi_reduction <minsi>, %47, %cst_4 [0] : vector<24x128xi32> to vector<128xi32>
    %49 = vector.shape_cast %48 : vector<128xi32> to vector<1x128xi32>
    %50 = vector.broadcast %40 : vector<1x128xf32> to vector<24x128xf32>
    %51 = arith.cmpf olt, %22, %50 : vector<24x128xf32>
    %52 = vector.broadcast %40 : vector<1x128xf32> to vector<24x128xf32>
    %53 = arith.cmpf oeq, %22, %52 : vector<24x128xf32>
    %54 = vector.broadcast %49 : vector<1x128xi32> to vector<24x128xi32>
    %55 = arith.cmpi slt, %11, %54 : vector<24x128xi32>
    %56 = arith.andi %53, %55 : vector<24x128xi1>
    %57 = arith.ori %51, %56 : vector<24x128xi1>
    %58 = arith.extui %57 : vector<24x128xi1> to vector<24x128xi32>
    %cst_5 = arith.constant dense<0> : vector<128xi32>
    %59 = vector.multi_reduction <add>, %58, %cst_5 [0] : vector<24x128xi32> to vector<128xi32>
    %60 = vector.shape_cast %59 : vector<128xi32> to vector<1x128xi32>
    %c0_i32_6 = arith.constant 0 : i32
    %61 = vector.broadcast %c0_i32_6 : i32 to vector<1x128xi32>
    %62 = arith.select %42, %60, %61 : vector<1x128xi1>, vector<1x128xi32>
    %63 = vector.broadcast %62 : vector<1x128xi32> to vector<24x128xi32>
    %64 = arith.cmpi eq, %11, %63 : vector<24x128xi32>
    %65 = vector.shape_cast %1 : vector<24x1xf32> to vector<24x1xf32>
    %66 = vector.broadcast %65 : vector<24x1xf32> to vector<24x128xf32>
    %67 = vector.shape_cast %2 : vector<24x1xf32> to vector<24x1xf32>
    %68 = vector.broadcast %67 : vector<24x1xf32> to vector<24x128xf32>
    %cst_7 = arith.constant 0.000000e+00 : f32
    %69 = vector.broadcast %cst_7 : f32 to vector<24x128xf32>
    %70 = arith.select %64, %66, %69 : vector<24x128xi1>, vector<24x128xf32>
    %cst_8 = arith.constant dense<0.000000e+00> : vector<128xf32>
    %71 = vector.multi_reduction <add>, %70, %cst_8 [0] : vector<24x128xf32> to vector<128xf32>
    %72 = vector.shape_cast %71 : vector<128xf32> to vector<1x128xf32>
    %cst_9 = arith.constant 0.000000e+00 : f32
    %73 = vector.broadcast %cst_9 : f32 to vector<24x128xf32>
    %74 = arith.select %64, %68, %73 : vector<24x128xi1>, vector<24x128xf32>
    %cst_10 = arith.constant dense<0.000000e+00> : vector<128xf32>
    %75 = vector.multi_reduction <add>, %74, %cst_10 [0] : vector<24x128xf32> to vector<128xf32>
    %76 = vector.shape_cast %75 : vector<128xf32> to vector<1x128xf32>
    %c0_11 = arith.constant 0 : index
    %77 = arith.index_cast %4 : i32 to index
    %78 = vector.load %arg3[%c0_11, %77] : memref<2x128xf32, #tpu.memory_space<vmem>>, vector<1x128xf32>
    tpu.vector_store %arg3[%c0_11, %77], %72 {strides = array<i32>} : memref<2x128xf32, #tpu.memory_space<vmem>>, vector<1x128xf32>,
    %c1 = arith.constant 1 : index
    %79 = arith.index_cast %4 : i32 to index
    %80 = vector.load %arg3[%c1, %79] : memref<2x128xf32, #tpu.memory_space<vmem>>, vector<1x128xf32>
    tpu.vector_store %arg3[%c1, %79], %76 {strides = array<i32>} : memref<2x128xf32, #tpu.memory_space<vmem>>, vector<1x128xf32>,
    %c1_i32 = arith.constant 1 : i32
    return
  }
  func.func @transform_0(%arg0: i32) -> (i32, i32) {
    %c0_i32 = arith.constant 0 : i32
    %c0_i32_0 = arith.constant 0 : i32
    return %c0_i32, %arg0 : i32, i32
  }
  func.func @transform_1(%arg0: i32) -> (i32, i32) {
    %c0_i32 = arith.constant 0 : i32
    %c0_i32_0 = arith.constant 0 : i32
    %c0_i32_1 = arith.constant 0 : i32
    return %c0_i32, %c0_i32_0 : i32, i32
  }
  func.func @transform_2(%arg0: i32) -> (i32, i32) {
    %c0_i32 = arith.constant 0 : i32
    %c0_i32_0 = arith.constant 0 : i32
    return %c0_i32, %arg0 : i32, i32
  }
}

</mosaic_0001>

<bundles_post_ra>
// kernel: tpu_custom_call.1
= control target key start
LH: loop header
LB: loop body
LE: loop exit
PB: predicated region body
PF: predicated region fallthrough
CT: control target
= control target key end

     0   :  { %v238_v1 = vmov 1   ;;  %v239_v2 = vmov 0   ;;  %s337_s0 = inlined_call_operand.vmem [shape: f32[4,128], index: 0, kind: input, shape index: {}]   ;;  %s338_s1 = inlined_call_operand.vmem [shape: f32[24,2], index: 1, kind: input, shape index: {}]   ;;  %s339_s2 = inlined_call_operand.hbm [shape: f32[2,128], index: 2, kind: output, shape index: {}]  }
   0x1   :  { %v12_v0 = vld [vmem:[%s338_s1] sm:$0xff]  ;;  %212 = vset.pattern.permute.xlu1 %v238_v1  ;;  %211 = vset.pattern.permute.xlu0 %v239_v2 }
   0x2   :  { %7 = vsyncpa [#allocation3], 0  ;;  %36 = vperm.xlu1 %212, %v12_v0   ;;  %22 = vperm.xlu0 %211, %v12_v0   ;;  %v13_v3 = vld [vmem:[%s338_s1 + $0x8] sm:$0xff]  ;;  %v14_v4 = vld [vmem:[%s338_s1 + $0x10] sm:$0xff]  ;;  %v16_v6 = vlaneseq }
   0x3   :  { %v15_v5 = vld [vmem:[%s337_s0] sm:$0xf]  ;;  %s240_s0 = smov [#allocation2]  }
   0x4   :  { %v94_v7 = vrot.slane %v15_v5, 2  ;;  %v269_v8 = vshrl.u32 %v16_v6, 7  ;;  %s200_s1 = sshll.u32 %s240_s0, 4  ;;  %s201_s1 = int_to_ptr.vmem [resolvable:$true] %s200_s1 }
   0x5   :  { %s214_s17 = scalar_lea.vmem %s201_s1, 32  ;;  %p219_p1 = scmp.lt.s32.totalorder %s201_s1, %s201_s1 }
   0x6   :  { %40 = vperm.xlu1 %212, %v13_v3   ;;  %27 = vperm.xlu0 %211, %v13_v3   ;;  %v96_v9 = vsub.f32 %v15_v5, %v94_v7  ;;  %v59_v10 = vsub.s32 1, %v269_v8  ;;  %v82_v11 = vsub.s32 3, %v269_v8  ;;  %v72_v12 = vsub.s32 2, %v269_v8  ;;  %p215_p0 = scmp.ne.s32.totalorder %s201_s1, %s214_s17  ;;  %p220_p2 = scmp.lt.s32.totalorder %s214_s17, %s214_s17 }
   0x7   :  { %v49_v14 = vsub.s32 0, %v269_v8  ;;  %v18_v6 = vadd.s32 8, %v269_v8  ;;  %v19_v7 = vadd.s32 16, %v269_v8 }
   0x8   :  { %v97_v13 = vmul.f32 %v96_v9, %v96_v9  ;;  %v60_v15 = vrot.slane %v15_v5, %v59_v10  ;;  %v83_v16 = vrot.slane %v15_v5, %v82_v11  ;;  %v73_v17 = vrot.slane %v15_v5, %v72_v12  ;;  %p221_p3 = por %p220_p2, %p219_p1 }
   0x9   :  { %v50_v19 = vrot.slane %v15_v5, %v49_v14 }
   0xa   :  { %44 = vperm.xlu1 %212, %v14_v4   ;;  %32 = vperm.xlu0 %211, %v14_v4   ;;  %v99_v18 = vrot.slane %v97_v13, 1  ;;  %p222_p4 = pnand %p221_p3, %p215_p0 }
   0xc   :  { %v101_v24 = vadd.f32 %v99_v18, %v97_v13 }
   0xe   :  { %213 = vset.pattern.permute.xlu0 %v238_v1  ;;  %v105_v32 = vrot.slane %v101_v24, %v49_v14 }
  0x81   :  { %v275_v20 = vpop.permute.xlu1 %36  ;;  %v277_v21 = vpop.permute.xlu0 %22 }
  0x82   :  { %v61_v22 = vsub.f32 %v60_v15, %v275_v20  ;;  %v84_v23 = vsub.f32 %v275_v20, %v83_v16  ;;  %v74_v25 = vsub.f32 %v277_v21, %v73_v17  ;;  %v51_v26 = vsub.f32 %v50_v19, %v277_v21 }
  0x84   :  { %v87_v27 = vmul.f32 %v84_v23, %v84_v23  ;;  %v77_v28 = vmul.f32 %v74_v25, %v74_v25  ;;  %v64_v31 = vmul.f32 %v61_v22, %v61_v22  ;;  %v54_v35 = vmul.f32 %v51_v26, %v51_v26 }
  0x85   :  { %v283_v29 = vpop.permute.xlu1 %40  ;;  %v285_v30 = vpop.permute.xlu0 %27 }
  0x86   :  { %v62_v33 = vsub.f32 %v60_v15, %v283_v29  ;;  %v85_v34 = vsub.f32 %v283_v29, %v83_v16  ;;  %v90_v36 = vadd.f32 %v87_v27, %v77_v28  ;;  %v52_v37 = vsub.f32 %v50_v19, %v285_v30 }
  0x87   :  { %v75_v38 = vsub.f32 %v285_v30, %v73_v17  ;;  %v67_v49 = vadd.f32 %v64_v31, %v54_v35 }
  0x88   :  { %v65_v39 = vmul.f32 %v62_v33, %v62_v33  ;;  %v88_v40 = vmul.f32 %v85_v34, %v85_v34  ;;  %v55_v41 = vmul.f32 %v52_v37, %v52_v37  ;;  %vm106_vm0 = vcmp.lt.f32.partialorder %v90_v36, %v105_v32 }
  0x89   :  { %v78_v42 = vmul.f32 %v75_v38, %v75_v38  ;;  %v291_v43 = vpop.permute.xlu1 %44  ;;  %v293_v44 = vpop.permute.xlu0 %32  ;;  %v109_v59 = vsel %vm106_vm0, %v67_v49, 1e+30 }
  0x8a   :  { %v63_v45 = vsub.f32 %v60_v15, %v291_v43  ;;  %v86_v46 = vsub.f32 %v291_v43, %v83_v16  ;;  %v53_v47 = vsub.f32 %v50_v19, %v293_v44  ;;  %v76_v48 = vsub.f32 %v293_v44, %v73_v17 }
  0x8b   :  { %v68_v50 = vadd.f32 %v65_v39, %v55_v41  ;;  %v91_v51 = vadd.f32 %v88_v40, %v78_v42 }
  0x8c   :  { %v66_v52 = vmul.f32 %v63_v45, %v63_v45  ;;  %v89_v53 = vmul.f32 %v86_v46, %v86_v46  ;;  %v56_v54 = vmul.f32 %v53_v47, %v53_v47  ;;  %v79_v55 = vmul.f32 %v76_v48, %v76_v48 }
  0x8d   :  { %vm107_vm1 = vcmp.lt.f32.partialorder %v91_v51, %v105_v32 }
  0x8e   :  { %v110_v56 = vsel %vm107_vm1, %v68_v50, 1e+30  ;;  %v69_v57 = vadd.f32 %v66_v52, %v56_v54  ;;  %v92_v58 = vadd.f32 %v89_v53, %v79_v55 }
  0x8f   :  { %v112_v60 = vmin.f32 %v109_v59, %v110_v56 }
  0x90   :  { %vm108_vm2 = vcmp.lt.f32.partialorder %v92_v58, %v105_v32 }
  0x91   :  { %v111_v61 = vsel %vm108_vm2, %v69_v57, 1e+30 }
  0x92   :  { %v113_v62 = vmin.f32 %v112_v60, %v111_v61 }
  0x94   :  { %v114_v63 = vrot.slane %v113_v62, 4 }
  0x96   :  { %v115_v0 = vmin.f32 %v113_v62, %v114_v63 }
  0x98   :  { %v116_v1 = vrot.slane %v115_v0, 2 }
  0x9a   :  { %v117_v3 = vmin.f32 %v115_v0, %v116_v1 }
  0x9c   :  { %v118_v4 = vrot.slane %v117_v3, 1 }
  0x9e   :  { %v119_v5 = vmin.f32 %v117_v3, %v118_v4 }
  0xa0   :  { %vm121_vm3 = vcmp.eq.f32.partialorder %v67_v49, %v119_v5  ;;  %vm122_vm4 = vcmp.eq.f32.partialorder %v68_v50, %v119_v5  ;;  %vm123_vm5 = vcmp.eq.f32.partialorder %v69_v57, %v119_v5 }
  0xa1   :  { %vm124_vm6 = vmand %vm106_vm0, %vm121_vm3 }
  0xa2   :  { %vm125_vm7 = vmand %vm107_vm1, %vm122_vm4  ;;  %v127_v9 = vsel %vm124_vm6, %v269_v8, 24  ;;  %vm143_vm6 = vcmp.lt.f32.partialorder %v67_v49, %v119_v5 }
  0xa3   :  { %vm126_vm8 = vmand %vm108_vm2, %vm123_vm5  ;;  %v128_v10 = vsel %vm125_vm7, %v18_v6, 24 }
  0xa4   :  { %vm130_vm9 = vcmp.lt.s32.totalorder %v127_v9, %v128_v10  ;;  %v129_v11 = vsel %vm126_vm8, %v19_v7, 24  ;;  %vm144_vm8 = vcmp.lt.f32.partialorder %v68_v50, %v119_v5 }
  0xa5   :  { %v131_v12 = vsel %vm130_vm9, %v127_v9, %v128_v10 }
  0xa6   :  { %vm132_vm10 = vcmp.lt.s32.totalorder %v131_v12, %v129_v11 }
  0xa7   :  { %v133_v13 = vsel %vm132_vm10, %v131_v12, %v129_v11  ;;  %vm145_vm10 = vcmp.lt.f32.partialorder %v69_v57, %v119_v5 }
  0xa8   :  { %v134_v14 = vrot.slane %v133_v13, 4 }
  0xaa   :  { %vm135_vm11 = vcmp.lt.s32.totalorder %v133_v13, %v134_v14 }
  0xab   :  { %v136_v15 = vsel %vm135_vm11, %v133_v13, %v134_v14 }
  0xac   :  { %v137_v16 = vrot.slane %v136_v15, 2 }
  0xae   :  { %vm138_vm12 = vcmp.lt.s32.totalorder %v136_v15, %v137_v16 }
  0xaf   :  { %v139_v17 = vsel %vm138_vm12, %v136_v15, %v137_v16 }
  0xb0   :  { %v140_v18 = vrot.slane %v139_v17, 1 }
  0xb2   :  { %vm141_vm13 = vcmp.lt.s32.totalorder %v139_v17, %v140_v18 }
  0xb3   :  { %v142_v19 = vsel %vm141_vm13, %v139_v17, %v140_v18 }
  0xb4   :  { %vm146_vm14 = vcmp.lt.s32.totalorder %v269_v8, %v142_v19  ;;  %vm147_vm15 = vcmp.lt.s32.totalorder %v18_v6, %v142_v19  ;;  %vm148_vm0 = vcmp.lt.s32.totalorder %v19_v7, %v142_v19 }
  0xb5   :  { %vm149_vm1 = vmand %vm121_vm3, %vm146_vm14  ;;  %vm120_vm3 = vcmp.lt.f32.partialorder %v119_v5, 1e+30 }
  0xb6   :  { %vm150_vm2 = vmand %vm122_vm4, %vm147_vm15 }
  0xb7   :  { %vm151_vm7 = vmand %vm123_vm5, %vm148_vm0 }
  0xb8   :  { %vm152_vm9 = vmor %vm143_vm6, %vm149_vm1 }
  0xb9   :  { %vm153_vm11 = vmor %vm144_vm8, %vm150_vm2  ;;  %v155_v22 = vsel %vm152_vm9, 1, %v239_v2 }
  0xba   :  { %vm154_vm12 = vmor %vm145_vm10, %vm151_vm7  ;;  %v156_v23 = vsel %vm153_vm11, 1, %v239_v2 }
  0xbb   :  { %v158_v24 = vadd.s32 %v156_v23, %v155_v22  ;;  %v157_v25 = vsel %vm154_vm12, 1, %v239_v2 }
  0xbd   :  { %v159_v26 = vadd.s32 %v158_v24, %v157_v25 }
  0xbf   :  { %v160_v27 = vrot.slane %v159_v26, 4 }
  0xc1   :  { %v161_v28 = vadd.s32 %v160_v27, %v159_v26 }
  0xc3   :  { %v162_v31 = vrot.slane %v161_v28, 2 }
  0xc5   :  { %v163_v32 = vadd.s32 %v162_v31, %v161_v28 }
  0xc7   :  { %v164_v33 = vrot.slane %v163_v32, 1 }
  0xc9   :  { %v165_v34 = vadd.s32 %v164_v33, %v163_v32 }
  0xcb   :  { %v166_v35 = vsel %vm120_vm3, %v165_v34, 0 }
  0xcc   :  { %vm167_vm4 = vcmp.eq.s32.totalorder %v269_v8, %v166_v35  ;;  %vm168_vm5 = vcmp.eq.s32.totalorder %v18_v6, %v166_v35  ;;  %vm169_vm13 = vcmp.eq.s32.totalorder %v19_v7, %v166_v35 }
  0xcd   :  { %v170_v36 = vsel %vm167_vm4, %v277_v21, 0.0  ;;  %v171_v37 = vsel %vm168_vm5, %v285_v30, 0.0  ;;  %v181_v38 = vsel %vm167_vm4, %v275_v20, 0.0  ;;  %v182_v39 = vsel %vm168_vm5, %v283_v29, 0.0 }
  0xce   :  { %v173_v2 = vadd.f32 %v171_v37, %v170_v36  ;;  %v172_v40 = vsel %vm169_vm13, %v293_v44, 0.0  ;;  %v184_v41 = vadd.f32 %v182_v39, %v181_v38  ;;  %v183_v45 = vsel %vm169_vm13, %v291_v43, 0.0 }
  0xd0   :  { %v174_v42 = vadd.f32 %v173_v2, %v172_v40  ;;  %v185_v46 = vadd.f32 %v184_v41, %v183_v45 }
  0xd2   :  { %v175_v47 = vrot.slane %v174_v42, 4  ;;  %v186_v8 = vrot.slane %v185_v46, 4 }
  0xd4   :  { %v176_v48 = vadd.f32 %v175_v47, %v174_v42  ;;  %v187_v49 = vadd.f32 %v186_v8, %v185_v46 }
  0xd6   :  { %v177_v50 = vrot.slane %v176_v48, 2  ;;  %v188_v21 = vrot.slane %v187_v49, 2 }
  0xd8   :  { %v178_v51 = vadd.f32 %v177_v50, %v176_v48  ;;  %v189_v30 = vadd.f32 %v188_v21, %v187_v49 }
  0xda   :  { %v179_v52 = vrot.slane %v178_v51, 1  ;;  %v190_v20 = vrot.slane %v189_v30, 1 }
  0xdc   :  { %v180_v29 = vadd.f32 %v179_v52, %v178_v51  ;;  %v191_v53 = vadd.f32 %v190_v20, %v189_v30 }
  0xde   :  { %192 = vst [vmem:[#allocation2] sm:$0x1] %v180_v29  ;;  %193 = vst [vmem:[#allocation2 + $0x1] sm:$0x1] %v191_v53 }
  0xdf   :  { %225 = shalt.err (!%p222_p4)
}
  0xe0   :  { %s226_s20 = scalar_lea.hbm %s339_s2, 32 }
  0xe1   :  { %p227_p5 = scmp.ne.s32.totalorder %s339_s2, %s226_s20  ;;  %p230_p6 = scmp.lt.u32.totalorder %s226_s20, %s339_s2 }
  0xe3   :  { %p232_p7 = pnand %p230_p6, %p227_p5 }
  0xe5   :  { %235 = shalt.err (!%p232_p7)
}
  0xe6   :  { %203 = dma.vmem_to_hbm [thread:$0]  %s201_s1, 32, %s339_s2, [#allocation3]  }
  0xe7   :  { %236 = dma.done.wait [#allocation3], 32  }
  0xe8   :  { %237 = vsyncadd [#allocation3], 4294967264 }
  0xe9   :  { %207 = vsyncpa [#allocation3], 1 }

</bundles_post_ra>
